<compile_context>
chip_gen: v5e
topology: v5e:2x2
jax: 0.10.0
libtpu: 0.0.40
codegen_flags: <defaults>
</compile_context>

<pallas_src>
import jax
import jax.numpy as jnp
from jax import lax
from jax.experimental import pallas as pl
from jax.experimental.pallas import tpu as pltpu


def _rdl_kernel(depth_ref, xcat_ref, ycat_ref, rel_ref, out_ref):
    H, W = depth_ref.shape           # (H, W) after squeezing (b, c) dims
    two_n = xcat_ref.shape[1]        # 2N gathered pixels (A then B)
    N = rel_ref.shape[1]             # number of pixel pairs

    depth = depth_ref[...].astype(jnp.float32)            # (H, W)
    x = xcat_ref[...]                                      # (1, 2N) row indices
    y = ycat_ref[...]                                      # (1, 2N) col indices

    # --- fused gather: z[p] = depth[x[p], y[p]] for all 2N pixels ----------
    # Column gather on the MXU: cols[h, p] = depth[h, y[p]]
    iota_w = lax.broadcasted_iota(jnp.int32, (W, two_n), 0)
    onehot_y = (iota_w == y).astype(jnp.float32)           # (W, 2N)
    cols = jnp.dot(depth, onehot_y,
                   preferred_element_type=jnp.float32)     # (H, 2N)
    # Row selection + cross-sublane reduce: z[p] = cols[x[p], p]
    iota_h = lax.broadcasted_iota(jnp.int32, (H, two_n), 0)
    onehot_x = (iota_h == x).astype(jnp.float32)           # (H, 2N)
    z = jnp.sum(cols * onehot_x, axis=0, keepdims=True)    # (1, 2N) lane-dense

    # --- ranking loss (lane-dense (1, N) math) ------------------------------
    pred = z[:, :N] - z[:, N:]                             # (1, N)
    rel = rel_ref[...].astype(jnp.float32)                 # (1, N)

    nz = rel != 0.0                                        # (1, N) bool
    nz_f = nz.astype(jnp.float32)
    n_nz = jnp.sum(nz_f, axis=1, keepdims=True)            # (1, 1)
    n_z = jnp.sum(1.0 - nz_f, axis=1, keepdims=True)       # (1, 1)

    # stable softplus(t) == log(1 + exp(t))
    t = -rel * pred
    log_terms = jnp.maximum(t, 0.0) + jnp.log(1.0 + jnp.exp(-jnp.abs(t)))

    log_loss = jnp.sum(jnp.where(nz, log_terms, 0.0),
                       axis=1, keepdims=True) / n_nz       # (1, 1)
    sq_loss = jnp.sum(jnp.where(nz, 0.0, pred * pred),
                      axis=1, keepdims=True) / n_z         # (1, 1)
    loss_b = log_loss + sq_loss                            # (1, 1)

    # Per-batch loss, broadcast into a fully aligned (8,128) block
    # (unmasked lane-dense store; wrapper reads element [0, 0]).
    out_ref[...] = jnp.broadcast_to(loss_b, out_ref.shape).astype(out_ref.dtype)


def relative_depth_loss(output, x_A, y_A, x_B, y_B, ordinal_relation):
    """output: (B, 1, H, W) f32; x_A/y_A/x_B/y_B: (B, N) int; ordinal: (B, N)."""
    B, C, H, W = output.shape
    assert C == 1
    N = x_A.shape[1]

    # Concatenate A/B index sets along the pair axis (lane axis in-kernel).
    xcat = jnp.concatenate([x_A, x_B], axis=1).astype(jnp.int32).reshape(B, 1, 2 * N)
    ycat = jnp.concatenate([y_A, y_B], axis=1).astype(jnp.int32).reshape(B, 1, 2 * N)
    rel = ordinal_relation.astype(jnp.float32).reshape(B, 1, N)

    cost = pl.CostEstimate(
        flops=2 * B * H * W * (2 * N) + 16 * B * N,   # one-hot gather matmul + loss math
        transcendentals=2 * B * N,                    # exp + log per pair
        bytes_accessed=B * (H * W * 4 + 2 * (2 * N) * 4 + N * 4 + 8 * 128 * 4),
    )

    out = pl.pallas_call(
        _rdl_kernel,
        out_shape=jax.ShapeDtypeStruct((B, 8, 128), jnp.float32),
        grid_spec=pltpu.PrefetchScalarGridSpec(
            num_scalar_prefetch=0,
            grid=(B,),
            in_specs=[
                pl.BlockSpec((None, None, H, W), lambda b: (b, 0, 0, 0)),
                pl.BlockSpec((None, 1, 2 * N), lambda b: (b, 0, 0)),
                pl.BlockSpec((None, 1, 2 * N), lambda b: (b, 0, 0)),
                pl.BlockSpec((None, 1, N), lambda b: (b, 0, 0)),
            ],
            out_specs=pl.BlockSpec((None, 8, 128), lambda b: (b, 0, 0)),
        ),
        compiler_params=pltpu.CompilerParams(
            dimension_semantics=("parallel",)),
        cost_estimate=cost,
    )(output, xcat, ycat, rel)

    # Each batch element's loss sits at out[b, 0, 0]; mean over batch = forward().
    return jnp.mean(out[:, 0, 0])


def _reference_loss(output, x_A, y_A, x_B, y_B, rel):
    # Pure-JAX mirror of the PyTorch forward, for verification only.
    B = output.shape[0]
    total = jnp.float32(0.0)
    for b in range(B):
        img = output[b, 0]
        zA = img[x_A[b], y_A[b]]
        zB = img[x_B[b], y_B[b]]
        pred = zA - zB
        r = rel[b].astype(jnp.float32)
        nz = r != 0
        log_loss = jnp.sum(jnp.where(nz, jnp.log(1.0 + jnp.exp(-r * pred)), 0.0)) \
            / jnp.sum(nz.astype(jnp.float32))
        sq_loss = jnp.sum(jnp.where(nz, 0.0, pred ** 2)) \
            / jnp.sum((~nz).astype(jnp.float32))
        total = total + log_loss + sq_loss
    return total / B


if __name__ == "__main__":
    B, H, W, N = 2, 16, 16, 8
    key = jax.random.PRNGKey(0)
    k_d, k_xa, k_ya, k_xb, k_yb = jax.random.split(key, 5)

    output = jax.random.normal(k_d, (B, 1, H, W), dtype=jnp.float32)
    x_A = jax.random.randint(k_xa, (B, N), 0, H, dtype=jnp.int32)
    y_A = jax.random.randint(k_ya, (B, N), 0, W, dtype=jnp.int32)
    x_B = jax.random.randint(k_xb, (B, N), 0, H, dtype=jnp.int32)
    y_B = jax.random.randint(k_yb, (B, N), 0, W, dtype=jnp.int32)
    # deterministic ordinal relations; both zero and nonzero entries per batch
    ordinal = jnp.array([[1, -1, 0, 1, 0, -1, 1, 0],
                         [0, 1, -1, 0, 1, -1, 0, 1]], dtype=jnp.float32)

    loss = relative_depth_loss(output, x_A, y_A, x_B, y_B, ordinal)
    loss = jax.block_until_ready(loss)

    ref = _reference_loss(output, x_A, y_A, x_B, y_B, ordinal)
    assert jnp.allclose(loss, ref, rtol=1e-5, atol=1e-5), (loss, ref)

    print("KERNEL_OK")
</pallas_src>

<mosaic_0001>
module attributes {stable_mosaic.version = 11 : i64} {
  func.func @_rdl_kernel(%arg0: i32, %arg1: memref<1x1x16x16xf32, #tpu.memory_space<vmem>>, %arg2: memref<1x1x16xi32, #tpu.memory_space<vmem>>, %arg3: memref<1x1x16xi32, #tpu.memory_space<vmem>>, %arg4: memref<1x1x8xf32, #tpu.memory_space<vmem>>, %arg5: memref<1x8x128xf32, #tpu.memory_space<vmem>>) attributes {dimension_semantics = [#tpu.dimension_semantics<parallel>], iteration_bounds = array<i64: 2>, scalar_prefetch = 0 : i64, scratch_operands = 0 : i64, tpu.core_type = #tpu.core_type<tc>, window_params = [{transform_indices = @transform_0, window_bounds = array<i64: 1, 1, 16, 16>}, {transform_indices = @transform_1, window_bounds = array<i64: 1, 1, 16>}, {transform_indices = @transform_2, window_bounds = array<i64: 1, 1, 16>}, {transform_indices = @transform_3, window_bounds = array<i64: 1, 1, 8>}, {transform_indices = @transform_4, window_bounds = array<i64: 1, 8, 128>}]} {
    %c0 = arith.constant 0 : index
    %c0_0 = arith.constant 0 : index
    %c0_1 = arith.constant 0 : index
    %c0_2 = arith.constant 0 : index
    %0 = vector.load %arg1[%c0, %c0_0, %c0_1, %c0_2] : memref<1x1x16x16xf32, #tpu.memory_space<vmem>>, vector<1x1x16x16xf32>
    %1 = vector.shape_cast %0 : vector<1x1x16x16xf32> to vector<16x16xf32>
    %c0_3 = arith.constant 0 : index
    %c0_4 = arith.constant 0 : index
    %c0_5 = arith.constant 0 : index
    %2 = vector.load %arg2[%c0_3, %c0_4, %c0_5] : memref<1x1x16xi32, #tpu.memory_space<vmem>>, vector<1x1x16xi32>
    %3 = vector.shape_cast %2 : vector<1x1x16xi32> to vector<1x16xi32>
    %c0_6 = arith.constant 0 : index
    %c0_7 = arith.constant 0 : index
    %c0_8 = arith.constant 0 : index
    %4 = vector.load %arg3[%c0_6, %c0_7, %c0_8] : memref<1x1x16xi32, #tpu.memory_space<vmem>>, vector<1x1x16xi32>
    %5 = vector.shape_cast %4 : vector<1x1x16xi32> to vector<1x16xi32>
    %6 = tpu.iota {dimensions = array<i32: 0>} : vector<16x16xi32>
    %7 = vector.broadcast %5 : vector<1x16xi32> to vector<16x16xi32>
    %8 = arith.cmpi eq, %6, %7 : vector<16x16xi32>
    %9 = arith.extui %8 : vector<16x16xi1> to vector<16x16xi32>
    %10 = arith.sitofp %9 : vector<16x16xi32> to vector<16x16xf32>
    %cst = arith.constant dense<0.000000e+00> : vector<16x16xf32>
    %11 = tpu.matmul %1, %10, %cst {dimension_numbers = #tpu.dot_dimension_numbers<[1], [0], [0], [1], [0, 0, 1, 1], [], []>} : vector<16x16xf32>, vector<16x16xf32>, vector<16x16xf32> -> vector<16x16xf32>
    %12 = tpu.iota {dimensions = array<i32: 0>} : vector<16x16xi32>
    %13 = vector.broadcast %3 : vector<1x16xi32> to vector<16x16xi32>
    %14 = arith.cmpi eq, %12, %13 : vector<16x16xi32>
    %15 = arith.extui %14 : vector<16x16xi1> to vector<16x16xi32>
    %16 = arith.sitofp %15 : vector<16x16xi32> to vector<16x16xf32>
    %17 = arith.mulf %11, %16 : vector<16x16xf32>
    %cst_9 = arith.constant dense<0.000000e+00> : vector<16xf32>
    %18 = vector.multi_reduction <add>, %17, %cst_9 [0] : vector<16x16xf32> to vector<16xf32>
    %19 = vector.shape_cast %18 : vector<16xf32> to vector<1x16xf32>
    %20 = vector.extract_strided_slice %19 {offsets = [0, 0], sizes = [1, 8], strides = [1, 1]} : vector<1x16xf32> to vector<1x8xf32>
    %21 = vector.extract_strided_slice %19 {offsets = [0, 8], sizes = [1, 8], strides = [1, 1]} : vector<1x16xf32> to vector<1x8xf32>
    %22 = arith.subf %20, %21 : vector<1x8xf32>
    %c0_10 = arith.constant 0 : index
    %c0_11 = arith.constant 0 : index
    %c0_12 = arith.constant 0 : index
    %23 = vector.load %arg4[%c0_10, %c0_11, %c0_12] : memref<1x1x8xf32, #tpu.memory_space<vmem>>, vector<1x1x8xf32>
    %24 = vector.shape_cast %23 : vector<1x1x8xf32> to vector<1x8xf32>
    %cst_13 = arith.constant 0.000000e+00 : f32
    %25 = vector.broadcast %cst_13 : f32 to vector<1x8xf32>
    %26 = arith.cmpf one, %24, %25 : vector<1x8xf32>
    %27 = arith.extui %26 : vector<1x8xi1> to vector<1x8xi32>
    %28 = arith.sitofp %27 : vector<1x8xi32> to vector<1x8xf32>
    %cst_14 = arith.constant dense<0.000000e+00> : vector<1xf32>
    %29 = vector.multi_reduction <add>, %28, %cst_14 [1] : vector<1x8xf32> to vector<1xf32>
    %30 = vector.shape_cast %29 : vector<1xf32> to vector<1x1xf32>
    %cst_15 = arith.constant 1.000000e+00 : f32
    %31 = vector.broadcast %cst_15 : f32 to vector<1x8xf32>
    %32 = arith.subf %31, %28 : vector<1x8xf32>
    %cst_16 = arith.constant dense<0.000000e+00> : vector<1xf32>
    %33 = vector.multi_reduction <add>, %32, %cst_16 [1] : vector<1x8xf32> to vector<1xf32>
    %34 = vector.shape_cast %33 : vector<1xf32> to vector<1x1xf32>
    %cst_17 = arith.constant 0.000000e+00 : f32
    %35 = vector.broadcast %cst_17 : f32 to vector<1x8xf32>
    %36 = arith.subf %35, %24 : vector<1x8xf32>
    %37 = arith.mulf %36, %22 : vector<1x8xf32>
    %cst_18 = arith.constant 0.000000e+00 : f32
    %38 = vector.broadcast %cst_18 : f32 to vector<1x8xf32>
    %39 = arith.maximumf %37, %38 : vector<1x8xf32>
    %40 = math.absf %37 : vector<1x8xf32>
    %cst_19 = arith.constant 0.000000e+00 : f32
    %41 = vector.broadcast %cst_19 : f32 to vector<1x8xf32>
    %42 = arith.subf %41, %40 : vector<1x8xf32>
    %43 = math.exp %42 : vector<1x8xf32>
    %cst_20 = arith.constant 1.000000e+00 : f32
    %44 = vector.broadcast %cst_20 : f32 to vector<1x8xf32>
    %45 = arith.addf %44, %43 : vector<1x8xf32>
    %46 = math.log %45 : vector<1x8xf32>
    %47 = arith.addf %39, %46 : vector<1x8xf32>
    %cst_21 = arith.constant 0.000000e+00 : f32
    %48 = vector.broadcast %cst_21 : f32 to vector<1x8xf32>
    %49 = arith.select %26, %47, %48 : vector<1x8xi1>, vector<1x8xf32>
    %cst_22 = arith.constant dense<0.000000e+00> : vector<1xf32>
    %50 = vector.multi_reduction <add>, %49, %cst_22 [1] : vector<1x8xf32> to vector<1xf32>
    %51 = vector.shape_cast %50 : vector<1xf32> to vector<1x1xf32>
    %52 = arith.divf %51, %30 : vector<1x1xf32>
    %53 = arith.mulf %22, %22 : vector<1x8xf32>
    %cst_23 = arith.constant 0.000000e+00 : f32
    %54 = vector.broadcast %cst_23 : f32 to vector<1x8xf32>
    %55 = arith.select %26, %54, %53 : vector<1x8xi1>, vector<1x8xf32>
    %cst_24 = arith.constant dense<0.000000e+00> : vector<1xf32>
    %56 = vector.multi_reduction <add>, %55, %cst_24 [1] : vector<1x8xf32> to vector<1xf32>
    %57 = vector.shape_cast %56 : vector<1xf32> to vector<1x1xf32>
    %58 = arith.divf %57, %34 : vector<1x1xf32>
    %59 = arith.addf %52, %58 : vector<1x1xf32>
    %60 = vector.shape_cast %59 : vector<1x1xf32> to vector<1x1xf32>
    %61 = vector.broadcast %60 : vector<1x1xf32> to vector<8x128xf32>
    %c0_25 = arith.constant 0 : index
    %c0_26 = arith.constant 0 : index
    %c0_27 = arith.constant 0 : index
    %62 = vector.load %arg5[%c0_25, %c0_26, %c0_27] : memref<1x8x128xf32, #tpu.memory_space<vmem>>, vector<1x8x128xf32>
    %63 = vector.shape_cast %62 : vector<1x8x128xf32> to vector<8x128xf32>
    %64 = vector.shape_cast %61 : vector<8x128xf32> to vector<1x8x128xf32>
    tpu.vector_store %arg5[%c0_25, %c0_26, %c0_27], %64 {strides = array<i32>} : memref<1x8x128xf32, #tpu.memory_space<vmem>>, vector<1x8x128xf32>,
    return
  }
  func.func @transform_0(%arg0: i32) -> (i32, i32, i32, i32) {
    %c0_i32 = arith.constant 0 : i32
    %c0_i32_0 = arith.constant 0 : i32
    %c0_i32_1 = arith.constant 0 : i32
    %c0_i32_2 = arith.constant 0 : i32
    return %arg0, %c0_i32, %c0_i32_0, %c0_i32_1 : i32, i32, i32, i32
  }
  func.func @transform_1(%arg0: i32) -> (i32, i32, i32) {
    %c0_i32 = arith.constant 0 : i32
    %c0_i32_0 = arith.constant 0 : i32
    %c0_i32_1 = arith.constant 0 : i32
    return %arg0, %c0_i32, %c0_i32_0 : i32, i32, i32
  }
  func.func @transform_2(%arg0: i32) -> (i32, i32, i32) {
    %c0_i32 = arith.constant 0 : i32
    %c0_i32_0 = arith.constant 0 : i32
    %c0_i32_1 = arith.constant 0 : i32
    return %arg0, %c0_i32, %c0_i32_0 : i32, i32, i32
  }
  func.func @transform_3(%arg0: i32) -> (i32, i32, i32) {
    %c0_i32 = arith.constant 0 : i32
    %c0_i32_0 = arith.constant 0 : i32
    %c0_i32_1 = arith.constant 0 : i32
    return %arg0, %c0_i32, %c0_i32_0 : i32, i32, i32
  }
  func.func @transform_4(%arg0: i32) -> (i32, i32, i32) {
    %c0_i32 = arith.constant 0 : i32
    %c0_i32_0 = arith.constant 0 : i32
    %c0_i32_1 = arith.constant 0 : i32
    return %arg0, %c0_i32, %c0_i32_0 : i32, i32, i32
  }
}

</mosaic_0001>

<bundles_post_ra>
// kernel: tpu_custom_call.1
= control target key start
LH: loop header
LB: loop body
LE: loop exit
PB: predicated region body
PF: predicated region fallthrough
CT: control target
= control target key end

     0   :  { %s1042_s0 = inlined_call_operand.hbm [shape: f32[2,1,16,16], index: 0, kind: input, shape index: {}]   ;;  %s1043_s1 = inlined_call_operand.hbm [shape: s32[2,1,16], index: 1, kind: input, shape index: {}]   ;;  %s1044_s2 = inlined_call_operand.hbm [shape: s32[2,1,16], index: 2, kind: input, shape index: {}]   ;;  %s1045_s3 = inlined_call_operand.vmem [shape: f32[2,1,8], index: 3, kind: input, shape index: {}]   ;;  %s1046_s4 = inlined_call_operand.hbm [shape: f32[2,8,128], index: 4, kind: output, shape index: {}]  }
   0x1   :  { %1048 = sst [smem:[#allocation14_spill]] %s1043_s1 }
   0x2   :  { %9 = vsyncpa [#allocation3], 0 }
   0x3   :  { %11 = vsyncpa [#allocation3 + $0x1], 0 }
   0x4   :  { %12 = vsyncpa [#allocation6], 0 }
   0x5   :  { %14 = vsyncpa [#allocation6 + $0x1], 0 }
   0x6   :  { %15 = vsyncpa [#allocation4], 0 }
   0x7   :  { %17 = vsyncpa [#allocation4 + $0x1], 0  ;;  %s849_s15 = smov 0   ;;  %s851_s16 = smov 0  }
   0x8   :  { %s853_s17 = smov 0   ;;  %s855_s18 = smov 0  }
   0x9 LB: > { %1049 = sst [smem:[#allocation12_spill]] %s813_s17  ;;  %s870_s19 = sadd.s32 4294967295, %s817_s18   ;;  %s817_s18 = sphi %s855_s18, %s1061_s18   ;;  %s813_s17 = sphi %s853_s17, %s1058_s17   ;;  %s809_s16 = sphi %s851_s16, %s1060_s16   ;;  %s805_s15 = sphi %s849_s15, %s1059_s15  }
   0xa   : > { %s561_s20 = sadd.s32 4294967294, %s817_s18   ;;  %s874_s21 = sadd.s32 1, %s817_s18  }
   0xb   : > { %s30_s22 = sadd.s32 1, %s813_s17  ;;  %s27_s23 = ssub.s32 %s817_s18, %s874_s21 }
   0xc   : > { %p37_p0 = scmp.ne.s32.totalorder %s813_s17, %s809_s16  ;;  %p28_p1 = scmp.eq.s32.totalorder %s27_s23, 0 }
   0xd   : > { %p38_p2 = scmp.eq.s32.totalorder %s817_s18, 0  ;;  %p43_p3 = scmp.ne.s32.totalorder %s809_s16, %s805_s15 }
   0xe   : > { %p44_p4 = scmp.eq.s32.totalorder %s870_s19, 0  ;;  %p145_p7 = scmp.eq.s32.totalorder %s870_s19, 1 }
   0xf   : > { %s886_s24 = scalar_select %p28_p1, %s813_s17, %s30_s22  }
  0x10   : > { %p39_p5 = por %p38_p2, %p37_p0  ;;  %p888_p6 = por %p44_p4, %p43_p3 }
  0x11   : > { %1050 = sst [smem:[#allocation13_spill]] %s886_s24  ;;  %p151_p8 = scmp.eq.s32.totalorder %s561_s20, 1 }
  0x12   : > { %p563_p9 = scmp.ge.s32.totalorder %s817_s18, 2  ;;  %p608_p10 = scmp.lt.s32.totalorder %s817_s18, 2 }
  0x13   : > { %p895_p11 = por %p145_p7, %p37_p0  ;;  %p899_p12 = por %p151_p8, %p43_p3 }
  0x14   : > { %s904_s28 = sand.u32 1, %s813_s17   ;;  %p906_p13 = pnand %p608_p10, %p39_p5 }
  0x15   : > { %s193_s30 = sand.u32 1, %s817_s18   ;;  %s1055_s1 = sld [smem:[#allocation14_spill]] }
  0x16   : > { %s196_s8 = scalar_lea.vmem [#allocation5], %s904_s28  ;;  %p567_p0 = scmp.ge.s32.totalorder %s817_s18, 1 }
  0x17   : > { %s203_s9 = sshll.u32 %s196_s8, 4  ;;  %s917_s11 = scalar_lea.sflag [#allocation6], %s193_s30  ;;  %s204_s9 = int_to_ptr.vmem [resolvable:$true] %s203_s9 }
  0x18   : > { %p661_p2 = pneg %p906_p13 }
  0x1b   : > { %s199_s7 = scalar_lea.hbm %s1055_s1, %s817_s18  ;;  %s664_s22 = scalar_lea.hbm %s1055_s1, 2 }
  0x1c   : > { %s201_s10 = sshll.u32 %s199_s7, 4  ;;  %s202_s10 = int_to_ptr.hbm [resolvable:$true] %s201_s10 }
  0x1d   : > { %s657_s12 = sshra.s32 %s202_s10, 4  ;;  %s658_s12 = int_to_ptr.hbm [resolvable:$true] %s657_s12 }
  0x1e   : > { %s659_s13 = scalar_lea.hbm %s658_s12, 1  ;;  %p665_p5 = scmp.lt.s32.totalorder %s658_s12, %s1055_s1 }
  0x1f   : > { %p660_p1 = scmp.ne.s32.totalorder %s658_s12, %s659_s13  ;;  %p666_p7 = scmp.lt.s32.totalorder %s664_s22, %s659_s13 }
  0x21   : > { %p662_p3 = pnand %p661_p2, %p660_p1  ;;  %p667_p8 = por %p666_p7, %p665_p5 }
  0x23   : > { %p663_p4 = pneg %p662_p3 }
  0x25   : > { %p668_p10 = pnand %p667_p8, %p663_p4 }
  0x27   : > { %671 = shalt.err (!%p668_p10)
}
  0x28   : > { %600 = dma.hbm_to_vmem [thread:$0]  (!%p906_p13), %s202_s10, 16, %s204_s9, %s917_s11  }
  0x29   : > { %p231_p1 = scmp.lt.s32.totalorder %s817_s18, 3  ;;  %s564_s30 = sshll.u32 %s904_s28, 4 }
  0x2a   : > { %s583_s6 = sshll.u32 %s817_s18, 4  ;;  %s175_s14 = scalar_lea.vmem [#allocation2], %s564_s30 }
  0x2b   : > { %p938_p3 = pnand %p567_p0, %p231_p1  ;;  %s180_s13 = scalar_lea.hbm %s1042_s0, %s583_s6 }
  0x2c   : > { %s183_s20 = sshll.u32 %s175_s14, 4  ;;  %s181_s22 = sshll.u32 %s180_s13, 4  ;;  %s184_s20 = int_to_ptr.vmem [resolvable:$true] %s183_s20  ;;  %s182_s22 = int_to_ptr.hbm [resolvable:$true] %s181_s22 }
  0x2d   : > { %s172_s23 = scalar_lea.sflag [#allocation3], %s904_s28  ;;  %s687_s9 = sshra.s32 %s182_s22, 4  ;;  %s688_s9 = int_to_ptr.hbm [resolvable:$true] %s687_s9 }
  0x2e   : > { %s689_s10 = scalar_lea.hbm %s688_s9, 16  ;;  %s694_s24 = scalar_lea.hbm %s1042_s0, 32 }
  0x2f   : > { %p690_p4 = scmp.ne.s32.totalorder %s688_s9, %s689_s10  ;;  %p695_p7 = scmp.lt.s32.totalorder %s688_s9, %s1042_s0 }
  0x30   : > { %p696_p8 = scmp.lt.s32.totalorder %s694_s24, %s689_s10 }
  0x31   : > { %p692_p0 = pnand %p690_p4, %p661_p2 }
  0x32   : > { %p697_p10 = por %p696_p8, %p695_p7 }
  0x33   : > { %p693_p5 = pneg %p692_p0 }
  0x35   : > { %p698_p1 = pnand %p697_p10, %p693_p5 }
  0x37   : > { %701 = shalt.err (!%p698_p1)
}
  0x38   : > { %s819_s30 = smov 128   ;;  %s820_s12 = smov 8  }
  0x39   : > { %597 = dma.hbm_to_vmem [thread:$0]  (!%p906_p13), %s182_s22, 256, %s184_s20, %s172_s23, %s819_s30, %s819_s30, %s820_s12  }
  0x3a   : > { %s216_s1 = scalar_lea.hbm %s1044_s2, %s817_s18  ;;  %s213_s5 = scalar_lea.vmem [#allocation7], %s904_s28 }
  0x3b   : > { %s220_s17 = sshll.u32 %s213_s5, 4  ;;  %s218_s8 = sshll.u32 %s216_s1, 4  ;;  %s221_s17 = int_to_ptr.vmem [resolvable:$true] %s220_s17  ;;  %s219_s8 = int_to_ptr.hbm [resolvable:$true] %s218_s8 }
  0x3c   : > { %s717_s24 = sshra.s32 %s219_s8, 4  ;;  %s724_s20 = scalar_lea.hbm %s1044_s2, 2  ;;  %s718_s24 = int_to_ptr.hbm [resolvable:$true] %s717_s24 }
  0x3d   : > { %s719_s9 = scalar_lea.hbm %s718_s24, 1  ;;  %p725_p7 = scmp.lt.s32.totalorder %s718_s24, %s1044_s2 }
  0x3e   : > { %p720_p4 = scmp.ne.s32.totalorder %s718_s24, %s719_s9  ;;  %p726_p8 = scmp.lt.s32.totalorder %s724_s20, %s719_s9 }
  0x40   : > { %p722_p0 = pnand %p720_p4, %p661_p2  ;;  %p727_p10 = por %p726_p8, %p725_p7 }
  0x42   : > { %p723_p5 = pneg %p722_p0 }
  0x44   : > { %p728_p1 = pnand %p727_p10, %p723_p5 }
  0x46   : > { %731 = shalt.err (!%p728_p1)
}
  0x47   : > { %603 = dma.hbm_to_vmem [thread:$0]  (!%p906_p13), %s219_s8, 16, %s221_s17, %s917_s11  }
  0x48   : > { %235 = sbr.rel (%p938_p3) target bundleno = 506 (0x1fa), region = 36  ;;  %s977_s28 = sand.u32 (!%p938_p3), 1, %s809_s16  }
  0x49   : > { %s568_s30 = sshll.u32 (!%p938_p3), %s977_s28, 4  ;;  %s238_s12 = scalar_lea.sflag (!%p938_p3), [#allocation3], %s977_s28 }
  0x4a   : > { %s241_s13 = scalar_lea.vmem (!%p938_p3), [#allocation2], %s568_s30 }
  0x4d   : > { %792 = dma.done.wait (%p888_p6), %s238_s12, 256  }
  0x4e   : > { %794 = vsyncadd (%p888_p6), %s238_s12, 4294967040  ;;  %s247_s17 = sand.u32 1, %s870_s19   ;;  %s250_s11 = scalar_lea.vmem [#allocation5], %s977_s28 }
  0x4f   : > { %s248_s29 = scalar_lea.sflag [#allocation6], %s247_s17 }
  0x50   : > { %796 = dma.done.wait (%p888_p6), %s248_s29, 32  }
  0x51   : > { %798 = vsyncadd (%p888_p6), %s248_s29, 4294967264  ;;  %v303_v0 = vlaneseq  ;;  %s259_s7 = scalar_lea.vmem [#allocation7], %s977_s28  ;;  %v821_v4 = vmov 1.0   ;;  %v299_v5 = vld [vmem:[%s241_s13] sm:$0xff]  ;;  %vm313_vm2 = vcmask 130048   ;;  %v300_v6 = vld [vmem:[%s241_s13 + $0x8] sm:$0xff] }
  0x52   : > { %v647_v3 = vld [vmem:[%s259_s7] ss:$0 sm:$0xff]  ;;  %p296_p6 = scmp.lt.s32.totalorder %s870_s19, 1  ;;  %v822_v8 = vmov 0.0   ;;  %vm370_vm4 = vcmask 57344   ;;  %s823_s8 = smov 120  }
  0x53   : > { %v304_v1 = vshrl.u32 %v303_v0, 7  ;;  %v648_v11 = vld [vmem:[%s250_s11] ss:$0 sm:$0xff]  ;;  %s569_s24 = sshll.u32 %s977_s28, 3  ;;  %s580_s9 = sshll.u32 %s870_s19, 3 }
  0x54   : > { %s297_s25 = scalar_select %p296_p6, %s870_s19, 1 }
  0x55   : > { %v305_v2 = vadd.s32 8, %v304_v1  ;;  %vm307_vm1 = vcmp.eq.s32.totalorder %v304_v1, %v647_v3  ;;  %vm344_vm5 = vcmp.eq.s32.totalorder %v304_v1, %v648_v11  ;;  %s442_s20 = scalar_lea.hbm %s1046_s4, %s580_s9  ;;  %s295_s22 = scalar_lea.vmem [#allocation8], %s569_s24 }
  0x56   : > { %s298_s5 = scalar_lea.vmem %s1045_s3, %s297_s25  ;;  %v576_v13 = vsel %vm344_vm5, 1.0, %v822_v8  ;;  %s444_s23 = sshll.u32 %s295_s22, 4  ;;  %s445_s23 = int_to_ptr.vmem [resolvable:$true] %s444_s23 }
  0x57   : > { %vm308_vm0 = vcmp.eq.s32.totalorder %v305_v2, %v647_v3  ;;  %v366_v7 = vld [vmem:[%s298_s5] sm:$0x1]  ;;  %vm345_vm6 = vcmp.eq.s32.totalorder %v305_v2, %v648_v11  ;;  %s446_s30 = sshll.u32 %s442_s20, 4  ;;  %s432_s19 = scalar_lea.sflag [#allocation4], %s977_s28  ;;  %s447_s30 = int_to_ptr.hbm [resolvable:$true] %s446_s30 }
  0x58   : > { %572 = vmatpush.msk.msra.mxu0 %vm308_vm0, %v821_v4  ;;  %584 = vmatpush.msk.msra.mxu1 %vm308_vm0, %v821_v4  ;;  %vm367_vm3 = vcmp.ne.f32.partialorder %v366_v7, 0.0  ;;  %v577_v14 = vsel %vm345_vm6, 1.0, %v822_v8  ;;  %v378_v29 = vsub.f32 0.0, %v366_v7  ;;  %s761_s12 = sshra.s32 %s447_s30, 4  ;;  %s767_s11 = scalar_lea.hbm %s1046_s4, 16  ;;  %s762_s12 = int_to_ptr.hbm [resolvable:$true] %s761_s12 }
  0x59   : > { %v578_v9 = vsel %vm367_vm3, 1.0, %v822_v8  ;;  %s763_s13 = scalar_lea.hbm %s762_s12, 8  ;;  %p768_p4 = scmp.lt.s32.totalorder %s762_s12, %s1046_s4 }
  0x5a   : > { %573 = vmatpush.msk.msra.mxu0 %vm307_vm1, %v821_v4  ;;  %585 = vmatpush.msk.msra.mxu1 %vm307_vm1, %v821_v4  ;;  %v374_v10 = vsub.f32 1.0, %v578_v9  ;;  %v371_v28 = vsel %vm370_vm4, %v578_v9, 0.0  ;;  %p764_p13 = scmp.ne.s32.totalorder %s762_s12, %s763_s13  ;;  %p769_p0 = scmp.lt.s32.totalorder %s767_s11, %s763_s13 }
  0x5b   : > { %574 = vmatmul.msk.f32.vlgmr.msra.gmra.mxu0 %vm313_vm2, %v299_v5  ;;  %575 = vmatmul.msk.f32.vlgmr.msra.gmra.mxu1 %vm313_vm2, %v300_v6 }
  0x5c   : > { %v375_v12 = vsel %vm370_vm4, %v374_v10, 0.0  ;;  %p765_p2 = pnand %p764_p13, %p895_p11  ;;  %p770_p5 = por %p769_p0, %p768_p4 }
  0x5d   : > { %376 = vadd.xlane.f32.xlu1 %v375_v12 }
  0x5e   : > { %p766_p3 = pneg %p765_p2 }
  0x60   : > { %p771_p7 = pnand %p770_p5, %p766_p3 }
  0xd0   : > { %v377_v47 = vpop.xlane.xlu1 %376 }
  0xd1   : > { %vm418_vm7 = vweird.f32 %v377_v47  ;;  %v424_v57 = vand.u32 2147483648, %v377_v47  ;;  %v422_v59 = vand.u32 2147483647, %v377_v47 }
  0xd3   : > { %v425_v63 = vor.u32 1.1754944e-38, %v424_v57  ;;  %vm423_vm13 = vcmp.eq.f32.partialorder %v422_v59, 8.507059e+37 }
  0xd8   : > { %v337_v15 = vpop.f32.mrf.mxu0  ;;  %v340_v16 = vpop.f32.mrf.mxu1 }
  0xd9   : > { %v350_v17 = vmul.f32 %v576_v13, %v337_v15  ;;  %v351_v18 = vmul.f32 %v577_v14, %v340_v16 }
  0xdb   : > { %v352_v19 = vsel %vm313_vm2, %v350_v17, 0.0  ;;  %v353_v20 = vsel %vm313_vm2, %v351_v18, 0.0 }
  0xdc   : > { %v354_v21 = vadd.f32 %v353_v20, %v352_v19 }
  0xde   : > { %v355_v22 = vrot.slane %v354_v21, 4 }
  0xe0   : > { %v356_v23 = vadd.f32 %v355_v22, %v354_v21 }
  0xe2   : > { %v357_v24 = vrot.slane %v356_v23, 2 }
  0xe4   : > { %v358_v25 = vadd.f32 %v357_v24, %v356_v23 }
  0xe6   : > { %v359_v26 = vrot.slane %v358_v25, 1 }
  0xe8   : > { %v360_v27 = vadd.f32 %v359_v26, %v358_v25 }
  0xea   : > { %362 = vrot.lane.b32.xlu0 %v360_v27, %s823_s8 }
 0x114   : > { %372 = vadd.xlane.f32.xlu0 %v371_v28 }
 0x15c   : > { %v363_v30 = vpop.permute.xlu0 %362 }
 0x15d   : > { %v365_v31 = vsub.f32 %v360_v27, %v363_v30 }
 0x15f   : > { %v379_v32 = vmul.f32 %v378_v29, %v365_v31  ;;  %v408_v33 = vmul.f32 %v365_v31, %v365_v31 }
 0x161   : > { %v381_v34 = vand.u32 2147483647, %v379_v32  ;;  %v409_v35 = vsel %vm367_vm3, 0.0, %v408_v33  ;;  %v380_v42 = vmax.f32 %v379_v32, 0.0 }
 0x162   : > { %v410_v36 = vsel %vm370_vm4, %v409_v35, 0.0 }
 0x163   : > { %v382_v37 = vsub.f32 0.0, %v381_v34  ;;  %411 = vadd.xlane.f32.xlu2 %v410_v36 }
 0x165   : > { %v383_v38 = vmul.f32 1.442695, %v382_v37 }
 0x167   : > { %649 = vpow2.f32 %v383_v38 }
 0x16d   : > { %v650_v39 = vpop.eup %649 }
 0x16e   : > { %v385_v40 = vadd.f32 1.0, %v650_v39 }
 0x170   : > { %651 = vlog2.f32 %v385_v40 }
 0x171   : > { %653 = vrcp.f32 %v377_v47 }
 0x176   : > { %v652_v41 = vpop.eup %651 }
 0x177   : > { %v387_v43 = vmul.f32 0.6931472, %v652_v41  ;;  %v654_v49 = vpop.eup %653 }
 0x178   : > { %v414_v51 = vmul.f32 %v654_v49, %v377_v47  ;;  %vm419_vm8 = vweird.f32 %v654_v49 }
 0x179   : > { %v388_v44 = vadd.f32 %v387_v43, %v380_v42  ;;  %vm420_vm11 = vmor %vm418_vm7, %vm419_vm8 }
 0x17a   : > { %v415_v53 = vsub.f32 1.0, %v414_v51 }
 0x17b   : > { %v389_v45 = vsel %vm367_vm3, %v388_v44, 0.0 }
 0x17c   : > { %v390_v46 = vsel %vm370_vm4, %v389_v45, 0.0  ;;  %v416_v55 = vmul.f32 %v654_v49, %v415_v53 }
 0x17d   : > { %391 = vadd.xlane.f32.xlu1 %v390_v46 }
 0x17e   : > { %v417_v58 = vadd.f32 %v654_v49, %v416_v55 }
 0x180   : > { %v421_v0 = vsel %vm420_vm11, %v654_v49, %v417_v58 }
 0x181   : > { %v426_v3 = vsel %vm423_vm13, %v425_v63, %v421_v0 }
 0x187   : > { %v373_v48 = vpop.xlane.xlu0 %372 }
 0x188   : > { %655 = vrcp.f32 %v373_v48  ;;  %vm398_vm9 = vweird.f32 %v373_v48  ;;  %v404_v60 = vand.u32 2147483648, %v373_v48  ;;  %v402_v62 = vand.u32 2147483647, %v373_v48 }
 0x18a   : > { %v405_v1 = vor.u32 1.1754944e-38, %v404_v60  ;;  %vm403_vm14 = vcmp.eq.f32.partialorder %v402_v62, 8.507059e+37 }
 0x18e   : > { %v656_v50 = vpop.eup %655 }
 0x18f   : > { %v394_v52 = vmul.f32 %v656_v50, %v373_v48  ;;  %vm399_vm10 = vweird.f32 %v656_v50 }
 0x190   : > { %vm400_vm12 = vmor %vm398_vm9, %vm399_vm10 }
 0x191   : > { %v395_v54 = vsub.f32 1.0, %v394_v52 }
 0x193   : > { %v396_v56 = vmul.f32 %v656_v50, %v395_v54 }
 0x195   : > { %v397_v61 = vadd.f32 %v656_v50, %v396_v56 }
 0x197   : > { %v401_v2 = vsel %vm400_vm12, %v656_v50, %v397_v61 }
 0x198   : > { %v406_v6 = vsel %vm403_vm14, %v405_v1, %v401_v2 }
 0x1d6   : > { %v412_v4 = vpop.xlane.xlu2 %411 }
 0x1d7   : > { %v427_v7 = vmul.f32 %v426_v3, %v412_v4 }
 0x1f0   : > { %v392_v5 = vpop.xlane.xlu1 %391 }
 0x1f1   : > { %v407_v8 = vmul.f32 %v406_v6, %v392_v5 }
 0x1f3   : > { %v428_v9 = vadd.f32 %v427_v7, %v407_v8 }
 0x1f5   : > { %v429_v10 = vperm.slane %v428_v9, 0 }
 0x1f7   : > { %430 = vst [vmem:[%s295_s22] sm:$0xff] %v429_v10 }
 0x1f8   : > { %774 = shalt.err (!%p771_p7)
}
 0x1f9   : > { %592 = dma.vmem_to_hbm [thread:$0]  (%p895_p11), %s445_s23, 128, %s447_s30, %s432_s19  }
 0x1fa PF: > { %s458_s28 = sand.u32 1, %s805_s15   ;;  %p605_p8 = pnand %p563_p9, %p899_p12 }
 0x1fb   : > { %s459_s14 = scalar_lea.sflag [#allocation4], %s458_s28 }
 0x1fc   : > { %p606_p10 = pneg %p605_p8 }
 0x1fe   : > { %800 = dma.done.wait (%p606_p10), %s459_s14, 128  }
 0x1ff   : > { %802 = vsyncadd (%p606_p10), %s459_s14, 4294967168  ;;  %s1057_s1 = sld [smem:[#allocation12_spill]]  ;;  %p20_p1 = scmp.ge.s32.totalorder %s874_s21, 4  }
 0x200   : > { %s1058_s17 = sld [smem:[#allocation13_spill]]  ;;  %s1059_s15 = smov %s809_s16 }
 0x201   : > { %s1061_s18 = smov %s874_s21  ;;  %22 = sbr.rel (!%p20_p1) target bundleno = 9 (0x9), region = 108 }
 0x205   : > { %s1060_s16 = smov %s1057_s1 }
 0x206   :  { %465 = vsyncpa [#allocation3], 1 }
 0x207   :  { %467 = vsyncpa [#allocation3 + $0x1], 1 }
 0x208   :  { %468 = vsyncpa [#allocation6], 1 }
 0x209   :  { %470 = vsyncpa [#allocation6 + $0x1], 1 }
 0x20a   :  { %471 = vsyncpa [#allocation4], 1 }
 0x20b   :  { %473 = vsyncpa [#allocation4 + $0x1], 1 }

</bundles_post_ra>
